<compile_context>
chip_gen: v7x
topology: tpu7x:2x2x1
jax: 0.10.0
libtpu: 0.0.40
codegen_flags: <defaults>
</compile_context>

<pallas_src>
import functools

import jax
import jax.numpy as jnp
from jax.experimental import pallas as pl
from jax.experimental.pallas import tpu as pltpu

_LANE = 128


def _accuracy_partial_kernel(gt_ref, pr_ref, out_ref, *, block_rows, valid_rows):
    """Per-grid-step match count, written as an (8, 128) int32 partial block."""
    # Elementwise compare in native dtype (VPU), widen to exact int32.
    eq = (gt_ref[...] == pr_ref[...]).astype(jnp.int32)          # (block_rows, 128)

    if valid_rows % block_rows != 0:
        # The last block extends past the array; mask the padded (garbage) rows.
        row = jax.lax.broadcasted_iota(jnp.int32, eq.shape, 0)
        global_row = pl.program_id(0) * block_rows + row
        eq = jnp.where(global_row < valid_rows, eq, 0)

    if block_rows % 8 == 0:
        # Pure VPU adds of (8, 128) vregs — defers all cross-lane reduction.
        partial = eq.reshape(block_rows // 8, 8, _LANE).sum(axis=0)
    else:
        # Rare path: a single full-dim block whose row count isn't a multiple of 8.
        row8 = jax.lax.broadcasted_iota(jnp.int32, (8, _LANE), 0)
        partial = jnp.where(row8 == 0, eq.sum(axis=0, keepdims=True), 0)

    out_ref[...] = partial.astype(jnp.int32)


def _normalize_dtype(y_pr, y_gt):
    """Compare labels in their native (narrow) dtype whenever possible."""
    if y_pr.dtype != y_gt.dtype:
        ct = jnp.promote_types(y_pr.dtype, y_gt.dtype)
        y_pr, y_gt = y_pr.astype(ct), y_gt.astype(ct)
    dt = y_pr.dtype
    if dt == jnp.bool_:
        y_pr, y_gt = y_pr.astype(jnp.uint8), y_gt.astype(jnp.uint8)
    elif dt.itemsize > 4:
        tgt = jnp.float32 if jnp.issubdtype(dt, jnp.floating) else jnp.int32
        y_pr, y_gt = y_pr.astype(tgt), y_gt.astype(tgt)
    return y_pr, y_gt


@functools.partial(
    jax.jit,
    static_argnames=("activation", "activation_dim", "block_rows", "min_pallas_elements"),
)
def accuracy(y_pr, y_gt, activation=None, activation_dim=None,
             block_rows=2048, min_pallas_elements=8192):
    """Pallas implementation of Accuracy.forward(y_pr, y_gt)."""
    # --- activation (identity is the module default) ---
    if activation is None or activation == "identity":
        pass
    elif activation == "argmax":
        # Faithful to torch.argmax(x, dim=None): dim=None argmaxes the flattened
        # tensor; pass activation_dim for a per-sample (class-axis) argmax.
        y_pr = jnp.argmax(y_pr, axis=activation_dim)
    elif activation == "argmax2d":
        y_pr = jnp.argmax(y_pr, axis=1)
    else:
        # TODO(synk): sigmoid/softmax/logsoftmax/tanh and callable activations
        # yield continuous outputs, for which sklearn.accuracy_score requires
        # discrete labels; not modeled here.
        raise ValueError(f"unsupported activation: {activation!r}")

    if y_pr.size != y_gt.size:
        raise ValueError("y_pr and y_gt must contain the same number of labels")

    y_pr, y_gt = _normalize_dtype(y_pr, y_gt)
    y_pr = y_pr.reshape(-1)
    y_gt = y_gt.reshape(-1)
    n = int(y_gt.shape[0])

    # Tiny inputs: Pallas launch / per-step overhead dominates; the fused XLA
    # compare+mean is faster.
    if n < min_pallas_elements:
        return jnp.mean((y_pr == y_gt).astype(jnp.float32))

    if n % _LANE != 0:
        # TODO(synk): ragged N needs a padded HBM copy here (concatenate); a
        # fully copy-free ragged path would require a manual-DMA 1-D variant.
        pad = (-n) % _LANE
        y_gt = jnp.concatenate([y_gt, jnp.zeros((pad,), y_gt.dtype)])
        # Mismatching sentinel so padded positions contribute zero matches.
        y_pr = jnp.concatenate([y_pr, jnp.ones((pad,), y_pr.dtype)])

    gt2d = y_gt.reshape(-1, _LANE)   # zero-cost, lane-dense view
    pr2d = y_pr.reshape(-1, _LANE)
    rows = gt2d.shape[0]
    itemsize = gt2d.dtype.itemsize

    # Round the tile row count to the sublane-packing multiple of the dtype
    # ((8,128) for 32-bit, (16,128) for 16-bit, (32,128) for 8-bit).
    mult = 8 * max(1, 4 // itemsize)
    br = max(mult, (int(block_rows) // mult) * mult)
    if rows < br:
        br = rows                    # single full-dim block is always legal

    num_blocks = pl.cdiv(rows, br)
    kernel = functools.partial(
        _accuracy_partial_kernel, block_rows=br, valid_rows=rows)

    partials = pl.pallas_call(
        kernel,
        out_shape=jax.ShapeDtypeStruct((num_blocks * 8, _LANE), jnp.int32),
        grid=(num_blocks,),
        in_specs=[
            pl.BlockSpec((br, _LANE), lambda i: (i, 0)),
            pl.BlockSpec((br, _LANE), lambda i: (i, 0)),
        ],
        out_specs=pl.BlockSpec((8, _LANE), lambda i: (i, 0)),
        compiler_params=pltpu.CompilerParams(
            dimension_semantics=("parallel",),
        ),
        cost_estimate=pl.CostEstimate(
            flops=rows * _LANE,
            transcendentals=0,
            bytes_accessed=2 * rows * _LANE * itemsize + num_blocks * 8 * _LANE * 4,
        ),
    )(gt2d, pr2d)

    matches = jnp.sum(partials)                     # exact int32 count
    # accuracy_score(normalize=True) = matches / n_samples (true n, not padded)
    return matches.astype(jnp.float32) / jnp.float32(n)


if __name__ == "__main__":
    key = jax.random.PRNGKey(0)
    k_gt, k_flip, k_noise = jax.random.split(key, 3)

    # Segmentation-style integer label maps: batch=2, H=96, W=128 -> N = 24576.
    shape = (2, 96, 128)
    num_classes = 10
    y_gt = jax.random.randint(k_gt, shape, 0, num_classes, dtype=jnp.int32)
    # Corrupt ~25% of the predictions so the accuracy is non-trivial.
    flip = jax.random.bernoulli(k_flip, p=0.25, shape=shape)
    noise = jax.random.randint(k_noise, shape, 1, num_classes, dtype=jnp.int32)
    y_pr = jnp.where(flip, (y_gt + noise) % num_classes, y_gt).astype(jnp.int32)

    def ref_acc(a, b):
        return float(jnp.mean((a.reshape(-1) == b.reshape(-1)).astype(jnp.float32)))

    # 1) multi-block pipelined grid with a masked tail (rows=192, br=80 -> 3 blocks)
    acc1 = jax.block_until_ready(accuracy(y_pr, y_gt, block_rows=80))
    assert abs(float(acc1) - ref_acc(y_pr, y_gt)) < 1e-6, (float(acc1), ref_acc(y_pr, y_gt))

    # 2) default config (single full-dim block)
    acc2 = jax.block_until_ready(accuracy(y_pr, y_gt))
    assert abs(float(acc2) - ref_acc(y_pr, y_gt)) < 1e-6, float(acc2)

    # 3) native narrow dtype (uint8 labels, no int32 upcast in HBM)
    acc3 = jax.block_until_ready(
        accuracy(y_pr.astype(jnp.uint8), y_gt.astype(jnp.uint8)))
    assert abs(float(acc3) - ref_acc(y_pr, y_gt)) < 1e-6, float(acc3)

    # 4) ragged N (not a multiple of 128) -> sentinel-padded kernel path
    pr_r = y_pr.reshape(-1)[:10256]
    gt_r = y_gt.reshape(-1)[:10256]
    acc4 = jax.block_until_ready(accuracy(pr_r, gt_r))
    assert abs(float(acc4) - ref_acc(pr_r, gt_r)) < 1e-6, float(acc4)

    # 5) tiny input -> plain-JAX fallback path
    pr_t = y_pr.reshape(-1)[:100]
    gt_t = y_gt.reshape(-1)[:100]
    acc5 = jax.block_until_ready(accuracy(pr_t, gt_t))
    assert abs(float(acc5) - ref_acc(pr_t, gt_t)) < 1e-6, float(acc5)

    print("KERNEL_OK")
</pallas_src>

<mosaic_0001>
module attributes {stable_mosaic.version = 11 : i64} {
  func.func @_accuracy_partial_kernel(%arg0: i32, %arg1: memref<80x128xi32, #tpu.memory_space<vmem>>, %arg2: memref<80x128xi32, #tpu.memory_space<vmem>>, %arg3: memref<8x128xi32, #tpu.memory_space<vmem>>) attributes {dimension_semantics = [#tpu.dimension_semantics<parallel>], iteration_bounds = array<i64: 3>, scalar_prefetch = 0 : i64, scratch_operands = 0 : i64, tpu.core_type = #tpu.core_type<tc>, window_params = [{transform_indices = @transform_0, window_bounds = array<i64: 80, 128>}, {transform_indices = @transform_1, window_bounds = array<i64: 80, 128>}, {transform_indices = @transform_2, window_bounds = array<i64: 8, 128>}]} {
    %c0 = arith.constant 0 : index
    %c0_0 = arith.constant 0 : index
    %0 = vector.load %arg1[%c0, %c0_0] : memref<80x128xi32, #tpu.memory_space<vmem>>, vector<80x128xi32>
    %c0_1 = arith.constant 0 : index
    %c0_2 = arith.constant 0 : index
    %1 = vector.load %arg2[%c0_1, %c0_2] : memref<80x128xi32, #tpu.memory_space<vmem>>, vector<80x128xi32>
    %2 = arith.cmpi eq, %0, %1 : vector<80x128xi32>
    %3 = arith.extui %2 : vector<80x128xi1> to vector<80x128xi32>
    %4 = tpu.iota {dimensions = array<i32: 0>} : vector<80x128xi32>
    %c80_i32 = arith.constant 80 : i32
    %5 = arith.muli %arg0, %c80_i32 : i32
    %6 = vector.broadcast %5 : i32 to vector<80x128xi32>
    %7 = arith.addi %6, %4 : vector<80x128xi32>
    %c192_i32 = arith.constant 192 : i32
    %8 = vector.broadcast %c192_i32 : i32 to vector<80x128xi32>
    %9 = arith.cmpi slt, %7, %8 : vector<80x128xi32>
    %c0_i32 = arith.constant 0 : i32
    %10 = vector.broadcast %c0_i32 : i32 to vector<80x128xi32>
    %11 = arith.select %9, %3, %10 : vector<80x128xi1>, vector<80x128xi32>
    %12 = vector.shape_cast %11 : vector<80x128xi32> to vector<10x8x128xi32>
    %cst = arith.constant dense<0> : vector<8x128xi32>
    %13 = vector.multi_reduction <add>, %12, %cst [0] : vector<10x8x128xi32> to vector<8x128xi32>
    %c0_3 = arith.constant 0 : index
    %c0_4 = arith.constant 0 : index
    %14 = vector.load %arg3[%c0_3, %c0_4] : memref<8x128xi32, #tpu.memory_space<vmem>>, vector<8x128xi32>
    tpu.vector_store %arg3[%c0_3, %c0_4], %13 {strides = array<i32>} : memref<8x128xi32, #tpu.memory_space<vmem>>, vector<8x128xi32>,
    return
  }
  func.func @transform_0(%arg0: i32) -> (i32, i32) {
    %c0_i32 = arith.constant 0 : i32
    %c0_i32_0 = arith.constant 0 : i32
    return %arg0, %c0_i32 : i32, i32
  }
  func.func @transform_1(%arg0: i32) -> (i32, i32) {
    %c0_i32 = arith.constant 0 : i32
    %c0_i32_0 = arith.constant 0 : i32
    return %arg0, %c0_i32 : i32, i32
  }
  func.func @transform_2(%arg0: i32) -> (i32, i32) {
    %c0_i32 = arith.constant 0 : i32
    %c0_i32_0 = arith.constant 0 : i32
    return %arg0, %c0_i32 : i32, i32
  }
}

</mosaic_0001>

<bundles_post_ra>
// kernel: accuracy.1
= control target key start
LH: loop header
LB: loop body
LE: loop exit
PB: predicated region body
PF: predicated region fallthrough
CT: control target
= control target key end

     0   :  { %7 = vsyncpa [#allocation3], 0  ;;  %s794_s0 = inlined_call_operand.hbm [shape: s32[192,128], index: 0, kind: input, shape index: {}]   ;;  %s795_s1 = inlined_call_operand.hbm [shape: s32[192,128], index: 1, kind: input, shape index: {}]   ;;  %s796_s2 = inlined_call_operand.vmem [shape: s32[24,128], index: 2, kind: output, shape index: {}]  }
   0x1   :  { %9 = vsyncpa [#allocation3 + $0x1], 0 }
   0x2   :  { %10 = vsyncpa [#allocation5], 0 }
   0x3   :  { %12 = vsyncpa [#allocation5 + $0x1], 0  ;;  %s584_s9 = smov 0   ;;  %s586_s10 = smov 0  }
   0x4   :  { %s588_s11 = smov 0   ;;  %s590_s12 = smov 0  }
   0x5 LB: > { %s603_s13 = sadd.s32 4294967295, %s560_s12   ;;  %s606_s14 = sadd.s32 1, %s560_s12   ;;  %s560_s12 = sphi %s590_s12, %s805_s12   ;;  %s556_s11 = sphi %s588_s11, %s804_s11   ;;  %s552_s10 = sphi %s586_s10, %s803_s10   ;;  %s548_s9 = sphi %s584_s9, %s802_s9  }
   0x6   : > { %s22_s15 = ssub.s32 %s560_s12, %s606_s14  ;;  %s25_s16 = sadd.s32 1, %s556_s11 }
   0x7   : > { %p23_p0 = scmp.eq.s32.totalorder %s22_s15, 0  ;;  %p32_p1 = scmp.ne.s32.totalorder %s556_s11, %s552_s10 }
   0x8   : > { %p33_p2 = scmp.eq.s32.totalorder %s560_s12, 0  ;;  %p38_p3 = scmp.ne.s32.totalorder %s552_s10, %s548_s9 }
   0x9   : > { %s616_s17 = scalar_select %p23_p0, %s556_s11, %s25_s16  }
   0xa   : > { %p618_p4 = por %p33_p2, %p32_p1  ;;  %p39_p5 = scmp.eq.s32.totalorder %s603_s13, 0 }
   0xb   : > { %p407_p7 = scmp.ge.s32.totalorder %s560_s12, 3 }
   0xc   : > { %p623_p6 = por %p39_p5, %p38_p3 }
   0xd   : > { %110 = sbr.rel (%p407_p7) target bundleno = 90 (0x5a), region = 16 }
  0x14   : > { %113 = sbr.rel (!%p618_p4) target bundleno = 55 (0x37), region = 20  ;;  %s114_s20 = sand.u32 (%p618_p4), 1, %s556_s11  }
  0x15   : > { %s119_s21 = smul.u32 (%p618_p4), 10, %s560_s12  ;;  %s635_s26 = scalar_lea.sflag (%p618_p4), [#allocation3], %s114_s20 }
  0x16   : > { %s424_s22 = smul.u32 (%p618_p4), 80, %s114_s20 }
  0x17   : > { %s120_s23 = ssub.s32 (%p618_p4), 24, %s119_s21 }
  0x18   : > { %p121_p8 = scmp.lt.s32.totalorder (%p618_p4), %s120_s23, 10  ;;  %s118_s27 = scalar_lea.vmem (%p618_p4), [#allocation2], %s424_s22 }
  0x1b   : > { %s807_s23 = smov (!%p121_p8, %s120_s23), 10 }
  0x1c   : > { %s632_s24 = sshll.u32 %s807_s23, 7 }
  0x1d   : > { %s125_s25 = ssub.s32 1280, %s632_s24 }
  0x1e   : > { %126 = vsyncadd %s635_s26, %s125_s25  ;;  %p409_p9 = scmp.ne.s32.totalorder %s632_s24, 0  ;;  %s422_s28 = smul.u32 1280, %s560_s12 }
  0x1f   : > { %s131_s29 = sshll.u32 %s118_s27, 4  ;;  %s470_s8 = scalar_lea.hbm %s794_s0, 3072  ;;  %s645_s29 = int_to_ptr.vmem [resolvable:$true] %s131_s29 }
  0x20   : > { %s643_s4 = scalar_lea.hbm %s794_s0, %s422_s28 }
  0x21   : > { %s466_s5 = scalar_lea.hbm %s643_s4, %s632_s24  ;;  %p471_p13 = scmp.lt.u32.totalorder %s643_s4, %s794_s0 }
  0x22   : > { %p467_p10 = scmp.ne.s32.totalorder %s643_s4, %s466_s5  ;;  %p472_p0 = scmp.lt.u32.totalorder %s470_s8, %s466_s5 }
  0x23   : > { %p474_p2 = scmp.lt.u32.totalorder %s466_s5, %s643_s4 }
  0x24   : > { %p468_p11 = pnand %p467_p10, %p409_p9  ;;  %p473_p1 = por %p472_p0, %p471_p13 }
  0x26   : > { %p469_p12 = pneg %p468_p11  ;;  %p475_p3 = por %p474_p2, %p473_p1 }
  0x28   : > { %p476_p5 = pnand %p475_p3, %p469_p12 }
  0x2a   : > { %479 = shalt.err (!%p476_p5)
}
  0x2b   : > { %s480_s16 = scalar_lea.vmem %s645_s29, %s632_s24  ;;  %s562_s20 = smov [#allocation2]  }
  0x2c   : > { %p481_p7 = scmp.ne.s32.totalorder %s645_s29, %s480_s16  ;;  %s484_s21 = sshll.u32 %s562_s20, 4  ;;  %s485_s21 = int_to_ptr.vmem [resolvable:$false] %s484_s21 }
  0x2d   : > { %s486_s22 = scalar_lea.vmem %s485_s21, 2560  ;;  %p487_p11 = scmp.lt.s32.totalorder %s645_s29, %s485_s21 }
  0x2e   : > { %p482_p8 = pnand %p481_p7, %p409_p9  ;;  %p488_p13 = scmp.lt.s32.totalorder %s486_s22, %s480_s16 }
  0x30   : > { %p483_p10 = pneg %p482_p8  ;;  %p489_p0 = por %p488_p13, %p487_p11 }
  0x32   : > { %p490_p1 = pnand %p489_p0, %p483_p10 }
  0x34   : > { %493 = shalt.err (!%p490_p1)
}
  0x35   : > { %s563_s23 = smov 128   ;;  %s564_s25 = smov 8  }
  0x36   : > { %137 = dma.hbm_to_vmem [thread:$0]  (%p409_p9), %s643_s4, %s632_s24, %s645_s29, %s635_s26, %s563_s23, %s563_s23, %s564_s25  }
  0x37 PF: > { %140 = sbr.rel (!%p618_p4) target bundleno = 90 (0x5a), region = 24  ;;  %s141_s27 = sand.u32 (%p618_p4), 1, %s556_s11  }
  0x38   : > { %s146_s28 = smul.u32 (%p618_p4), 10, %s560_s12  ;;  %s679_s7 = scalar_lea.sflag (%p618_p4), [#allocation5], %s141_s27 }
  0x39   : > { %s425_s30 = smul.u32 (%p618_p4), 80, %s141_s27 }
  0x3a   : > { %s147_s3 = ssub.s32 (%p618_p4), 24, %s146_s28 }
  0x3b   : > { %p148_p12 = scmp.lt.s32.totalorder (%p618_p4), %s147_s3, 10  ;;  %s145_s24 = scalar_lea.vmem (%p618_p4), [#allocation4], %s425_s30 }
  0x3e   : > { %s809_s3 = smov (!%p148_p12, %s147_s3), 10 }
  0x3f   : > { %s676_s5 = sshll.u32 %s809_s3, 7 }
  0x40   : > { %s152_s6 = ssub.s32 1280, %s676_s5 }
  0x41   : > { %153 = vsyncadd %s679_s7, %s152_s6  ;;  %p414_p4 = scmp.ne.s32.totalorder %s676_s5, 0  ;;  %s423_s18 = smul.u32 1280, %s560_s12 }
  0x42   : > { %s158_s26 = sshll.u32 %s145_s24, 4  ;;  %s498_s20 = scalar_lea.hbm %s795_s1, 3072  ;;  %s689_s26 = int_to_ptr.vmem [resolvable:$true] %s158_s26 }
  0x43   : > { %s687_s8 = scalar_lea.hbm %s795_s1, %s423_s18 }
  0x44   : > { %s494_s9 = scalar_lea.hbm %s687_s8, %s676_s5  ;;  %p499_p5 = scmp.lt.u32.totalorder %s687_s8, %s795_s1 }
  0x45   : > { %p495_p9 = scmp.ne.s32.totalorder %s687_s8, %s494_s9  ;;  %p500_p7 = scmp.lt.u32.totalorder %s498_s20, %s494_s9 }
  0x46   : > { %p502_p10 = scmp.lt.u32.totalorder %s494_s9, %s687_s8 }
  0x47   : > { %p496_p2 = pnand %p495_p9, %p414_p4  ;;  %p501_p8 = por %p500_p7, %p499_p5 }
  0x49   : > { %p497_p3 = pneg %p496_p2  ;;  %p503_p11 = por %p502_p10, %p501_p8 }
  0x4b   : > { %p504_p13 = pnand %p503_p11, %p497_p3 }
  0x4d   : > { %507 = shalt.err (!%p504_p13)
}
  0x4e   : > { %s508_s23 = scalar_lea.vmem %s689_s26, %s676_s5  ;;  %s565_s25 = smov [#allocation4]  }
  0x4f   : > { %p509_p0 = scmp.ne.s32.totalorder %s689_s26, %s508_s23  ;;  %s512_s27 = sshll.u32 %s565_s25, 4  ;;  %s513_s27 = int_to_ptr.vmem [resolvable:$false] %s512_s27 }
  0x50   : > { %s514_s28 = scalar_lea.vmem %s513_s27, 2560  ;;  %p515_p9 = scmp.lt.s32.totalorder %s689_s26, %s513_s27 }
  0x51   : > { %p510_p1 = pnand %p509_p0, %p414_p4  ;;  %p516_p2 = scmp.lt.s32.totalorder %s514_s28, %s508_s23 }
  0x53   : > { %p511_p12 = pneg %p510_p1  ;;  %p517_p5 = por %p516_p2, %p515_p9 }
  0x55   : > { %p518_p7 = pnand %p517_p5, %p511_p12 }
  0x57   : > { %521 = shalt.err (!%p518_p7)
}
  0x58   : > { %s566_s30 = smov 128   ;;  %s567_s3 = smov 8  }
  0x59   : > { %164 = dma.hbm_to_vmem [thread:$0]  (%p414_p4), %s687_s8, %s676_s5, %s689_s26, %s679_s7, %s566_s30, %s566_s30, %s567_s3  }
  0x5a PF: > { %p418_p3 = scmp.ge.s32.totalorder %s560_s12, 1  ;;  %p166_p8 = scmp.lt.s32.totalorder %s560_s12, 4 }
  0x5c   : > { %p167_p10 = pnand %p418_p3, %p166_p8 }
  0x5d   : > { %s172_s6 = sand.u32 (!%p167_p10), 1, %s552_s10  }
  0x5e   : > { %170 = sbr.rel (%p167_p10) target bundleno = 132 (0x84), region = 28  ;;  %s173_s18 = scalar_lea.sflag (!%p167_p10), [#allocation3], %s172_s6 }
  0x5f   : > { %s426_s24 = smul.u32 (!%p167_p10), 80, %s172_s6 }
  0x61   : > { %s719_s29 = scalar_lea.vmem (!%p167_p10), [#allocation2], %s426_s24 }
  0x65   : > { %539 = dma.done.wait (%p623_p6), %s173_s18, 1280  }
  0x66   : > { %541 = vsyncadd (%p623_p6), %s173_s18, 4294966016  ;;  %s182_s5 = scalar_lea.sflag [#allocation5], %s172_s6  ;;  %s725_s7 = scalar_lea.vmem [#allocation4], %s426_s24 }
  0x67   : > { %543 = dma.done.wait (%p623_p6), %s182_s5, 1280  }
  0x68   : > { %545 = vsyncadd (%p623_p6), %s182_s5, 4294966016  ;;  %v264_v0 = vlaneseq  ;;  %s275_s12 = smul.u32 80, %s603_s13  ;;  %v224_v15 = vld [vmem:[%s719_s29] sm:$0xff]  ;;  %v225_v16 = vld [vmem:[%s719_s29 + $0x8] sm:$0xff]  ;;  %v568_v40 = vmov 0   ;;  %p220_p6 = scmp.lt.s32.totalorder %s603_s13, 2 }
  0x69   : > { %v226_v17 = vld [vmem:[%s719_s29 + $0x10] sm:$0xff]  ;;  %v227_v22 = vld [vmem:[%s719_s29 + $0x18] sm:$0xff]  ;;  %v228_v23 = vld [vmem:[%s719_s29 + $0x20] sm:$0xff] }
  0x6a   : > { %v265_v1 = vshrl.u32 %v264_v0, 7  ;;  %v276_v2 = vstv %s275_s12  ;;  %v229_v24 = vld [vmem:[%s719_s29 + $0x28] sm:$0xff]  ;;  %v230_v27 = vld [vmem:[%s719_s29 + $0x30] sm:$0xff]  ;;  %v231_v28 = vld [vmem:[%s719_s29 + $0x38] sm:$0xff]  ;;  %s811_s13 = smov (!%p220_p6, %s603_s13), 2 }
  0x6b   : > { %v232_v29 = vld [vmem:[%s719_s29 + $0x40] sm:$0xff]  ;;  %v233_v30 = vld [vmem:[%s719_s29 + $0x48] sm:$0xff]  ;;  %v236_v34 = vld [vmem:[%s725_s7 + $0x10] sm:$0xff]  ;;  %s419_s19 = sshll.u32 %s811_s13, 3 }
  0x6c   : > { %v266_v3 = vadd.s32 8, %v265_v1  ;;  %v267_v4 = vadd.s32 16, %v265_v1  ;;  %v268_v5 = vadd.s32 24, %v265_v1  ;;  %v269_v6 = vadd.s32 32, %v265_v1  ;;  %v234_v31 = vld [vmem:[%s725_s7] sm:$0xff]  ;;  %v235_v32 = vld [vmem:[%s725_s7 + $0x8] sm:$0xff]  ;;  %s223_s8 = scalar_lea.vmem %s796_s2, %s419_s19 }
  0x6d   : > { %v270_v7 = vadd.s32 40, %v265_v1  ;;  %v271_v8 = vadd.s32 48, %v265_v1  ;;  %v272_v9 = vadd.s32 56, %v265_v1  ;;  %v273_v10 = vadd.s32 64, %v265_v1  ;;  %v237_v35 = vld [vmem:[%s725_s7 + $0x18] sm:$0xff]  ;;  %v238_v36 = vld [vmem:[%s725_s7 + $0x20] sm:$0xff] }
  0x6e   : > { %v274_v11 = vadd.s32 72, %v265_v1  ;;  %v732_v12 = vadd.s32 %v276_v2, %v265_v1  ;;  %v734_v13 = vadd.s32 %v276_v2, %v266_v3  ;;  %v736_v14 = vadd.s32 %v276_v2, %v267_v4  ;;  %v239_v37 = vld [vmem:[%s725_s7 + $0x28] sm:$0xff]  ;;  %v240_v38 = vld [vmem:[%s725_s7 + $0x30] sm:$0xff]  ;;  %v241_v39 = vld [vmem:[%s725_s7 + $0x38] sm:$0xff] }
  0x6f   : > { %v280_v18 = vadd.s32 %v276_v2, %v268_v5  ;;  %v281_v19 = vadd.s32 %v276_v2, %v269_v6  ;;  %v282_v20 = vadd.s32 %v276_v2, %v270_v7  ;;  %v283_v21 = vadd.s32 %v276_v2, %v271_v8  ;;  %v242_v42 = vld [vmem:[%s725_s7 + $0x40] sm:$0xff]  ;;  %v243_v43 = vld [vmem:[%s725_s7 + $0x48] sm:$0xff] }
  0x70   : > { %v284_v25 = vadd.s32 %v276_v2, %v272_v9  ;;  %v285_v26 = vadd.s32 %v276_v2, %v273_v10  ;;  %vm287_vm0 = vcmp.lt.s32.totalorder %v732_v12, 192  ;;  %vm288_vm1 = vcmp.lt.s32.totalorder %v734_v13, 192 }
  0x71   : > { %vm289_vm2 = vcmp.lt.s32.totalorder %v736_v14, 192  ;;  %vm290_vm3 = vcmp.lt.s32.totalorder %v280_v18, 192  ;;  %v286_v33 = vadd.s32 %v276_v2, %v274_v11  ;;  %vm291_vm4 = vcmp.lt.s32.totalorder %v281_v19, 192 }
  0x72   : > { %vm292_vm5 = vcmp.lt.s32.totalorder %v282_v20, 192  ;;  %vm244_vm7 = vcmp.eq.s32.totalorder %v224_v15, %v234_v31  ;;  %vm245_vm8 = vcmp.eq.s32.totalorder %v225_v16, %v235_v32  ;;  %vm246_vm11 = vcmp.eq.s32.totalorder %v226_v17, %v236_v34 }
  0x73   : > { %vm247_vm12 = vcmp.eq.s32.totalorder %v227_v22, %v237_v35  ;;  %vm248_vm13 = vcmp.eq.s32.totalorder %v228_v23, %v238_v36  ;;  %v254_v41 = vsel %vm244_vm7, 1, %v568_v40  ;;  %vm249_vm14 = vcmp.eq.s32.totalorder %v229_v24, %v239_v37 }
  0x74   : > { %vm250_vm15 = vcmp.eq.s32.totalorder %v230_v27, %v240_v38  ;;  %vm251_vm6 = vcmp.eq.s32.totalorder %v231_v28, %v241_v39  ;;  %v255_v44 = vsel %vm245_vm8, 1, %v568_v40  ;;  %vm252_vm9 = vcmp.eq.s32.totalorder %v232_v29, %v242_v42 }
  0x75   : > { %vm253_vm10 = vcmp.eq.s32.totalorder %v233_v30, %v243_v43  ;;  %v256_v45 = vsel %vm246_vm11, 1, %v568_v40  ;;  %v257_v46 = vsel %vm247_vm12, 1, %v568_v40  ;;  %v258_v47 = vsel %vm248_vm13, 1, %v568_v40 }
  0x76   : > { %v259_v48 = vsel %vm249_vm14, 1, %v568_v40  ;;  %v260_v49 = vsel %vm250_vm15, 1, %v568_v40  ;;  %v261_v50 = vsel %vm251_vm6, 1, %v568_v40  ;;  %v262_v51 = vsel %vm252_vm9, 1, %v568_v40 }
  0x77   : > { %v263_v52 = vsel %vm253_vm10, 1, %v568_v40  ;;  %vm296_vm7 = vcmp.lt.s32.totalorder %v286_v33, 192  ;;  %v297_v53 = vsel %vm287_vm0, %v254_v41, 0  ;;  %v298_v54 = vsel %vm288_vm1, %v255_v44, 0 }
  0x78   : > { %v299_v55 = vsel %vm289_vm2, %v256_v45, 0  ;;  %v300_v56 = vsel %vm290_vm3, %v257_v46, 0  ;;  %v301_v57 = vsel %vm291_vm4, %v258_v47, 0  ;;  %v302_v58 = vsel %vm292_vm5, %v259_v48, 0 }
  0x79   : > { %vm799_vm6 = vcmp.lt.s32.totalorder %v283_v21, 192  ;;  %vm800_vm8 = vcmp.lt.s32.totalorder %v284_v25, 192  ;;  %vm801_vm9 = vcmp.lt.s32.totalorder %v285_v26, 192  ;;  %v306_v62 = vsel %vm296_vm7, %v263_v52, 0 }
  0x7a   : > { %v303_v59 = vsel %vm799_vm6, %v260_v49, 0  ;;  %v304_v60 = vsel %vm800_vm8, %v261_v50, 0  ;;  %v305_v61 = vsel %vm801_vm9, %v262_v51, 0  ;;  %v307_v63 = vadd.s32 %v301_v57, %v297_v53 }
  0x7b   : > { %v308_v0 = vadd.s32 %v302_v58, %v298_v54  ;;  %v309_v1 = vadd.s32 %v303_v59, %v299_v55  ;;  %v310_v2 = vadd.s32 %v304_v60, %v300_v56 }
  0x7c   : > { %v311_v3 = vadd.s32 %v307_v63, %v305_v61 }
  0x7d   : > { %v312_v4 = vadd.s32 %v308_v0, %v306_v62  ;;  %v314_v5 = vadd.s32 %v310_v2, %v309_v1 }
  0x7f   : > { %v313_v6 = vadd.s32 %v312_v4, %v311_v3 }
  0x81   : > { %v315_v7 = vadd.s32 %v314_v5, %v313_v6 }
  0x83   : > { %316 = vst [vmem:[%s223_s8] sm:$0xff] %v315_v7 }
  0x84 PF: > { %p15_p4 = scmp.ge.s32.totalorder %s606_s14, 5   ;;  %s802_s9 = smov %s552_s10 }
  0x85   : > { %s803_s10 = smov %s556_s11  ;;  %s804_s11 = smov %s616_s17 }
  0x86   : > { %s805_s12 = smov %s606_s14  ;;  %17 = sbr.rel (!%p15_p4) target bundleno = 5 (0x5), region = 81 }
  0x8d   :  { %336 = vsyncpa [#allocation3], 1 }
  0x8e   :  { %338 = vsyncpa [#allocation3 + $0x1], 1 }
  0x8f   :  { %339 = vsyncpa [#allocation5], 1 }
  0x90   :  { %341 = vsyncpa [#allocation5 + $0x1], 1 }

</bundles_post_ra>
